<compile_context>
chip_gen: v6e
topology: v6e:2x2x1
jax: 0.10.0
libtpu: 0.0.40
codegen_flags: <defaults>
</compile_context>

<pallas_src>
import functools

import jax
import jax.numpy as jnp
from jax.experimental import pallas as pl
from jax.experimental.pallas import tpu as pltpu


# ---------------------------------------------------------------------------
# Pallas kernel: FR forward for `nb` batch elements, channels-first.
# ---------------------------------------------------------------------------
def fr_kernel(xall_ref, wc_ref, bc_ref, wm_ref, bm_ref, wp_ref, bp_ref, o_ref,
              *, C, nb, matmul_dtype):
    md = matmul_dtype
    wc = wc_ref[...]          # (2C, 2C)  fused c1/c2
    bc = bc_ref[...]          # (2C, 1)
    wm = wm_ref[...]          # (2C, 2C)  block-diag fused (affine) MLP_1/MLP_2
    bm = bm_ref[...]          # (2C, 1)
    wp = wp_ref[...]          # (2C, 2C)  fused proj1/proj2
    bp = bp_ref[...]          # (2C, 1)

    def one(xr):
        """xr: (4C, HW) = [x1; x2; fe1; fe2]. Returns (2C, HW) = [po1; po2]."""
        x12 = xr[:2 * C]                          # (2C, HW) = [x1; x2]
        fe12 = xr[2 * C:]                         # (2C, HW) = [fe1; fe2]
        hw = x12.shape[-1]

        # fused c1/c2: rows[:C] = x1x, rows[C:] = x2x  -- single MXU dot.
        cat12 = (jnp.dot(wc, x12.astype(md), preferred_element_type=jnp.float32)
                 + bc)                            # (2C, HW) f32

        # spatial (HW) softmax branch, both streams at once.
        # NOTE: exp-of-exp mirrors the reference module (overflow-fragile).
        e = jnp.exp(cat12)
        ee = jnp.exp(e - jnp.max(e, axis=-1, keepdims=True))
        s = (jnp.sum(ee * cat12, axis=-1, keepdims=True)
             / jnp.sum(ee, axis=-1, keepdims=True))            # (2C, 1)

        # fused affine MLP_1/MLP_2 + sigmoid gate (one tiny matvec).
        fg = jax.nn.sigmoid(
            jnp.dot(wm, s, preferred_element_type=jnp.float32) + bm)   # (2C, 1)

        x_sw = jnp.concatenate([x12[C:], x12[:C]], axis=0)      # [x2; x1]
        re12 = x12 * fg + x_sw                                   # (2C, HW)

        # channel softmax gate (softmax over C = sublane axis), per stream.
        def ch_gate(re):                                         # (C,HW) -> (1,HW)
            sp = jnp.exp(re)
            eec = jnp.exp(sp - jnp.max(sp, axis=0, keepdims=True))
            return (jnp.sum(eec * re, axis=0, keepdims=True)
                    / jnp.sum(eec, axis=0, keepdims=True))

        gate = jnp.concatenate(
            [jnp.broadcast_to(ch_gate(re12[:C]), (C, hw)),
             jnp.broadcast_to(ch_gate(re12[C:]), (C, hw))], axis=0)
        co12 = x12 * gate + x_sw + fe12                          # (2C, HW)

        # fused proj1/proj2: rows[:C] = po1, rows[C:] = po2 -- single MXU dot.
        return (jnp.dot(wp, co12.astype(md), preferred_element_type=jnp.float32)
                + bp)

    # nb is a small compile-time constant (VMEM-bounded); unrolled statically.
    for i in range(nb):
        o_ref[i] = one(xall_ref[i]).astype(o_ref.dtype)


# ---------------------------------------------------------------------------
# Wrapper: NCHW glue, weight fusion, batch blocking, VMEM budget.
# ---------------------------------------------------------------------------
def fr_pallas(x1, x2, fe1, fe2, params, *, matmul_dtype=None,
              out_dtype=jnp.float32, batch_block=None):
    N, C, H, W = x1.shape
    HW = H * W
    C2 = 2 * C
    f32 = jnp.float32
    if matmul_dtype is None:
        # bf16 MXU operands only pay off once the O(C^2*HW) dots bind.
        matmul_dtype = jnp.bfloat16 if C >= 128 else jnp.float32

    # --- single stacked input: (N, 4C, HW) = [x1; x2; fe1; fe2] per element.
    xall = jnp.concatenate(
        [a.reshape(N, C, HW) for a in (x1, x2, fe1, fe2)], axis=1)

    # --- fused weights -------------------------------------------------------
    def bias_col(a, b):
        return jnp.concatenate([a, b]).reshape(C2, 1).astype(f32)

    wc = jnp.concatenate([params["c1_w"], params["c2_w"]], axis=0).astype(matmul_dtype)
    bc = bias_col(params["c1_b"], params["c2_b"])
    # MLP_i = Conv1x1 -> Conv1x1 with no nonlinearity: collapse to one affine.
    m1w = params["m1_2_w"] @ params["m1_1_w"]
    m1b = params["m1_2_w"] @ params["m1_1_b"] + params["m1_2_b"]
    m2w = params["m2_2_w"] @ params["m2_1_w"]
    m2b = params["m2_2_w"] @ params["m2_1_b"] + params["m2_2_b"]
    z = jnp.zeros_like(m1w)
    wm = jnp.concatenate([jnp.concatenate([m1w, z], axis=1),
                          jnp.concatenate([z, m2w], axis=1)], axis=0).astype(f32)
    bm = bias_col(m1b, m2b)
    wp = jnp.concatenate([params["p1_w"], params["p2_w"]], axis=0).astype(matmul_dtype)
    bp = bias_col(params["p1_b"], params["p2_b"])
    weights = [wc, bc, wm, bm, wp, bp]

    # --- VMEM budget & batch-block selection ---------------------------------
    try:
        vmem_cap = int(getattr(pltpu.get_tpu_info(), "vmem_capacity_bytes",
                               64 << 20))
    except Exception:
        vmem_cap = 64 << 20                      # conservative (v7x per-core)
    budget = int(vmem_cap * 0.75)                # leave compiler headroom

    act = C * HW * 4                             # one (C, HW) f32 slab
    wbytes = sum(int(w.size) * w.dtype.itemsize for w in weights)
    out_itemsize = jnp.dtype(out_dtype).itemsize

    def needed_bytes(nb):
        in_blk = nb * 4 * act                    # (nb, 4C, HW) f32, x2 buffers
        out_blk = nb * C2 * HW * out_itemsize    # (nb, 2C, HW),   x2 buffers
        live = nb * 14 * act                     # cat12/e/ee/x_sw/re12/gate/co12
        return 2 * in_blk + 2 * out_blk + 2 * wbytes + live

    if batch_block is None:
        nb = 1
        for cand in range(1, N + 1):
            if N % cand:
                continue
            if N >= 2 and N // cand < 2:
                continue       # keep >=2 grid steps so v7x can use both TCs
            if needed_bytes(cand) <= budget:
                nb = cand
    else:
        nb = batch_block
    assert N % nb == 0, "batch_block must divide N"

    vmem_limit = int(min(max(needed_bytes(nb) * 1.25, 16 << 20), budget))

    grid_spec = pltpu.PrefetchScalarGridSpec(
        num_scalar_prefetch=0,
        grid=(N // nb,),
        in_specs=[pl.BlockSpec((nb, 4 * C, HW), lambda b: (b, 0, 0))]
                 + [pl.BlockSpec(w.shape, lambda b: (0, 0)) for w in weights],
        out_specs=pl.BlockSpec((nb, C2, HW), lambda b: (b, 0, 0)),
    )

    kernel = functools.partial(fr_kernel, C=C, nb=nb, matmul_dtype=matmul_dtype)
    out = pl.pallas_call(
        kernel,
        out_shape=jax.ShapeDtypeStruct((N, C2, HW), out_dtype),
        grid_spec=grid_spec,
        compiler_params=pltpu.CompilerParams(
            dimension_semantics=("parallel",),
            vmem_limit_bytes=vmem_limit),
    )(xall, *weights)

    out = out.reshape(N, C2, H, W)
    return out[:, :C], out[:, C:]


# ---------------------------------------------------------------------------
# Pure-JAX reference (mirrors the PyTorch forward, NCHW, unfused MLPs).
# ---------------------------------------------------------------------------
def fr_ref(x1, x2, fe1, fe2, P):
    N, C, H, W = x1.shape

    def conv1x1(x, w, b):
        return jnp.einsum("oc,nchw->nohw", w, x) + b[None, :, None, None]

    xc = jnp.concatenate([x1, x2], axis=1)
    x1x = conv1x1(xc, P["c1_w"], P["c1_b"])
    x2x = conv1x1(xc, P["c2_w"], P["c2_b"])

    def branch_sp(xx, w1, b1, w2, b2, xin):
        e = jnp.exp(xx)
        sm = jax.nn.softmax(e.reshape(N, C, -1), axis=2).reshape(xx.shape)
        s = jnp.sum(sm * xx, axis=(2, 3), keepdims=True)
        h = conv1x1(s, w1, b1)
        h = conv1x1(h, w2, b2)
        return xin * jax.nn.sigmoid(h)

    w_x1 = branch_sp(x1x, P["m1_1_w"], P["m1_1_b"], P["m1_2_w"], P["m1_2_b"], x1)
    w_x2 = branch_sp(x2x, P["m2_1_w"], P["m2_1_b"], P["m2_2_w"], P["m2_2_b"], x2)
    re1 = w_x1 + x2
    re2 = w_x2 + x1

    def branch_ch(re, xin, other):
        sp = jnp.exp(re)
        sm = jax.nn.softmax(sp, axis=1)
        s = jnp.sum(sm * re, axis=1, keepdims=True)
        return xin * s + other

    co1 = branch_ch(re1, x1, x2) + fe1
    co2 = branch_ch(re2, x2, x1) + fe2
    re = jnp.concatenate([co1, co2], axis=1)
    po1 = conv1x1(re, P["p1_w"], P["p1_b"])
    po2 = conv1x1(re, P["p2_w"], P["p2_b"])
    return po1, po2


# ---------------------------------------------------------------------------
# Deterministic parameter init (shapes match nn.Conv2d(k=1) weights, squeezed).
# ---------------------------------------------------------------------------
def init_params(key, dim):
    names_shapes = {
        "c1": (dim, 2 * dim), "c2": (dim, 2 * dim),
        "m1_1": (dim, dim), "m1_2": (dim, dim),
        "m2_1": (dim, dim), "m2_2": (dim, dim),
        "p1": (dim, 2 * dim), "p2": (dim, 2 * dim),
    }
    params = {}
    for name, shape in names_shapes.items():
        key, kw, kb = jax.random.split(key, 3)
        params[name + "_w"] = 0.2 * jax.random.normal(kw, shape, jnp.float32)
        params[name + "_b"] = 0.1 * jax.random.normal(kb, (shape[0],), jnp.float32)
    return params


if __name__ == "__main__":
    # N=4 exercises the batch-blocked path (nb=2 -> 2 grid steps).
    N, C, H, W = 4, 4, 16, 16
    key = jax.random.PRNGKey(0)
    k1, k2, k3, k4, kp = jax.random.split(key, 5)
    x1 = jax.random.normal(k1, (N, C, H, W), jnp.float32)
    x2 = jax.random.normal(k2, (N, C, H, W), jnp.float32)
    fe1 = jax.random.normal(k3, (N, C, H, W), jnp.float32)
    fe2 = jax.random.normal(k4, (N, C, H, W), jnp.float32)
    params = init_params(kp, C)

    po1, po2 = fr_pallas(x1, x2, fe1, fe2, params)
    jax.block_until_ready((po1, po2))

    r1, r2 = fr_ref(x1, x2, fe1, fe2, params)
    assert po1.shape == (N, C, H, W) and po2.shape == (N, C, H, W)
    # f32 operands + exact division in the softmax normalizations; 1e-2 covers
    # MXU-vs-XLA f32 matmul precision differences through the exp-of-exp chain.
    assert jnp.allclose(po1, r1, rtol=1e-2, atol=1e-2)
    assert jnp.allclose(po2, r2, rtol=1e-2, atol=1e-2)

    print("KERNEL_OK")
</pallas_src>

<mosaic_0001>
module attributes {stable_mosaic.version = 11 : i64} {
  func.func @fr_kernel(%arg0: i32, %arg1: memref<2x16x256xf32, #tpu.memory_space<vmem>>, %arg2: memref<8x8xf32, #tpu.memory_space<vmem>>, %arg3: memref<8x1xf32, #tpu.memory_space<vmem>>, %arg4: memref<8x8xf32, #tpu.memory_space<vmem>>, %arg5: memref<8x1xf32, #tpu.memory_space<vmem>>, %arg6: memref<8x8xf32, #tpu.memory_space<vmem>>, %arg7: memref<8x1xf32, #tpu.memory_space<vmem>>, %arg8: memref<2x8x256xf32, #tpu.memory_space<vmem>>) attributes {dimension_semantics = [#tpu.dimension_semantics<parallel>], iteration_bounds = array<i64: 2>, scalar_prefetch = 0 : i64, scratch_operands = 0 : i64, tpu.core_type = #tpu.core_type<tc>, window_params = [{transform_indices = @transform_0, window_bounds = array<i64: 2, 16, 256>}, {pipeline_mode = #tpu.pipeline_mode<synchronous>, transform_indices = @transform_1, window_bounds = array<i64: 8, 8>}, {pipeline_mode = #tpu.pipeline_mode<synchronous>, transform_indices = @transform_2, window_bounds = array<i64: 8, 1>}, {pipeline_mode = #tpu.pipeline_mode<synchronous>, transform_indices = @transform_3, window_bounds = array<i64: 8, 8>}, {pipeline_mode = #tpu.pipeline_mode<synchronous>, transform_indices = @transform_4, window_bounds = array<i64: 8, 1>}, {pipeline_mode = #tpu.pipeline_mode<synchronous>, transform_indices = @transform_5, window_bounds = array<i64: 8, 8>}, {pipeline_mode = #tpu.pipeline_mode<synchronous>, transform_indices = @transform_6, window_bounds = array<i64: 8, 1>}, {transform_indices = @transform_7, window_bounds = array<i64: 2, 8, 256>}]} {
    %c0 = arith.constant 0 : index
    %c0_0 = arith.constant 0 : index
    %0 = vector.load %arg2[%c0, %c0_0] : memref<8x8xf32, #tpu.memory_space<vmem>>, vector<8x8xf32>
    %c0_1 = arith.constant 0 : index
    %c0_2 = arith.constant 0 : index
    %1 = vector.load %arg3[%c0_1, %c0_2] : memref<8x1xf32, #tpu.memory_space<vmem>>, vector<8x1xf32>
    %c0_3 = arith.constant 0 : index
    %c0_4 = arith.constant 0 : index
    %2 = vector.load %arg4[%c0_3, %c0_4] : memref<8x8xf32, #tpu.memory_space<vmem>>, vector<8x8xf32>
    %c0_5 = arith.constant 0 : index
    %c0_6 = arith.constant 0 : index
    %3 = vector.load %arg5[%c0_5, %c0_6] : memref<8x1xf32, #tpu.memory_space<vmem>>, vector<8x1xf32>
    %c0_7 = arith.constant 0 : index
    %c0_8 = arith.constant 0 : index
    %4 = vector.load %arg6[%c0_7, %c0_8] : memref<8x8xf32, #tpu.memory_space<vmem>>, vector<8x8xf32>
    %c0_9 = arith.constant 0 : index
    %c0_10 = arith.constant 0 : index
    %5 = vector.load %arg7[%c0_9, %c0_10] : memref<8x1xf32, #tpu.memory_space<vmem>>, vector<8x1xf32>
    %c0_11 = arith.constant 0 : index
    %c0_12 = arith.constant 0 : index
    %c0_13 = arith.constant 0 : index
    %6 = vector.load %arg1[%c0_11, %c0_12, %c0_13] : memref<2x16x256xf32, #tpu.memory_space<vmem>>, vector<1x16x256xf32>
    %7 = vector.shape_cast %6 : vector<1x16x256xf32> to vector<16x256xf32>
    %8 = vector.extract_strided_slice %7 {offsets = [0, 0], sizes = [8, 256], strides = [1, 1]} : vector<16x256xf32> to vector<8x256xf32>
    %9 = vector.extract_strided_slice %7 {offsets = [8, 0], sizes = [8, 256], strides = [1, 1]} : vector<16x256xf32> to vector<8x256xf32>
    %cst = arith.constant dense<0.000000e+00> : vector<8x256xf32>
    %10 = tpu.matmul %0, %8, %cst {dimension_numbers = #tpu.dot_dimension_numbers<[1], [0], [0], [1], [0, 0, 1, 1], [], []>} : vector<8x8xf32>, vector<8x256xf32>, vector<8x256xf32> -> vector<8x256xf32>
    %11 = vector.broadcast %1 : vector<8x1xf32> to vector<8x256xf32>
    %12 = arith.addf %10, %11 : vector<8x256xf32>
    %13 = math.exp %12 : vector<8x256xf32>
    %cst_14 = arith.constant dense<0xFF800000> : vector<8xf32>
    %14 = vector.multi_reduction <maximumf>, %13, %cst_14 [1] : vector<8x256xf32> to vector<8xf32>
    %15 = vector.shape_cast %14 : vector<8xf32> to vector<8x1xf32>
    %16 = vector.broadcast %15 : vector<8x1xf32> to vector<8x256xf32>
    %17 = arith.subf %13, %16 : vector<8x256xf32>
    %18 = math.exp %17 : vector<8x256xf32>
    %19 = arith.mulf %18, %12 : vector<8x256xf32>
    %cst_15 = arith.constant dense<0.000000e+00> : vector<8xf32>
    %20 = vector.multi_reduction <add>, %19, %cst_15 [1] : vector<8x256xf32> to vector<8xf32>
    %21 = vector.shape_cast %20 : vector<8xf32> to vector<8x1xf32>
    %cst_16 = arith.constant dense<0.000000e+00> : vector<8xf32>
    %22 = vector.multi_reduction <add>, %18, %cst_16 [1] : vector<8x256xf32> to vector<8xf32>
    %23 = vector.shape_cast %22 : vector<8xf32> to vector<8x1xf32>
    %24 = arith.divf %21, %23 : vector<8x1xf32>
    %cst_17 = arith.constant dense<0.000000e+00> : vector<8x1xf32>
    %25 = tpu.matmul %2, %24, %cst_17 {dimension_numbers = #tpu.dot_dimension_numbers<[1], [0], [0], [1], [0, 0, 1, 1], [], []>} : vector<8x8xf32>, vector<8x1xf32>, vector<8x1xf32> -> vector<8x1xf32>
    %26 = arith.addf %25, %3 : vector<8x1xf32>
    %27 = arith.negf %26 : vector<8x1xf32>
    %28 = math.exp %27 : vector<8x1xf32>
    %cst_18 = arith.constant 1.000000e+00 : f32
    %29 = vector.broadcast %cst_18 : f32 to vector<8x1xf32>
    %30 = arith.addf %29, %28 : vector<8x1xf32>
    %31 = arith.divf %29, %30 : vector<8x1xf32>
    %32 = vector.extract_strided_slice %8 {offsets = [4, 0], sizes = [4, 256], strides = [1, 1]} : vector<8x256xf32> to vector<4x256xf32>
    %33 = vector.extract_strided_slice %8 {offsets = [0, 0], sizes = [4, 256], strides = [1, 1]} : vector<8x256xf32> to vector<4x256xf32>
    %34 = tpu.concatenate %32, %33 in 0 : vector<4x256xf32>, vector<4x256xf32> -> vector<8x256xf32>
    %35 = vector.broadcast %31 : vector<8x1xf32> to vector<8x256xf32>
    %36 = arith.mulf %8, %35 : vector<8x256xf32>
    %37 = arith.addf %36, %34 : vector<8x256xf32>
    %38 = vector.extract_strided_slice %37 {offsets = [0, 0], sizes = [4, 256], strides = [1, 1]} : vector<8x256xf32> to vector<4x256xf32>
    %39 = math.exp %38 : vector<4x256xf32>
    %cst_19 = arith.constant dense<0xFF800000> : vector<256xf32>
    %40 = vector.multi_reduction <maximumf>, %39, %cst_19 [0] : vector<4x256xf32> to vector<256xf32>
    %41 = vector.shape_cast %40 : vector<256xf32> to vector<1x256xf32>
    %42 = vector.broadcast %41 : vector<1x256xf32> to vector<4x256xf32>
    %43 = arith.subf %39, %42 : vector<4x256xf32>
    %44 = math.exp %43 : vector<4x256xf32>
    %45 = arith.mulf %44, %38 : vector<4x256xf32>
    %cst_20 = arith.constant dense<0.000000e+00> : vector<256xf32>
    %46 = vector.multi_reduction <add>, %45, %cst_20 [0] : vector<4x256xf32> to vector<256xf32>
    %47 = vector.shape_cast %46 : vector<256xf32> to vector<1x256xf32>
    %cst_21 = arith.constant dense<0.000000e+00> : vector<256xf32>
    %48 = vector.multi_reduction <add>, %44, %cst_21 [0] : vector<4x256xf32> to vector<256xf32>
    %49 = vector.shape_cast %48 : vector<256xf32> to vector<1x256xf32>
    %50 = arith.divf %47, %49 : vector<1x256xf32>
    %51 = vector.shape_cast %50 : vector<1x256xf32> to vector<1x256xf32>
    %52 = vector.broadcast %51 : vector<1x256xf32> to vector<4x256xf32>
    %53 = vector.extract_strided_slice %37 {offsets = [4, 0], sizes = [4, 256], strides = [1, 1]} : vector<8x256xf32> to vector<4x256xf32>
    %54 = math.exp %53 : vector<4x256xf32>
    %cst_22 = arith.constant dense<0xFF800000> : vector<256xf32>
    %55 = vector.multi_reduction <maximumf>, %54, %cst_22 [0] : vector<4x256xf32> to vector<256xf32>
    %56 = vector.shape_cast %55 : vector<256xf32> to vector<1x256xf32>
    %57 = vector.broadcast %56 : vector<1x256xf32> to vector<4x256xf32>
    %58 = arith.subf %54, %57 : vector<4x256xf32>
    %59 = math.exp %58 : vector<4x256xf32>
    %60 = arith.mulf %59, %53 : vector<4x256xf32>
    %cst_23 = arith.constant dense<0.000000e+00> : vector<256xf32>
    %61 = vector.multi_reduction <add>, %60, %cst_23 [0] : vector<4x256xf32> to vector<256xf32>
    %62 = vector.shape_cast %61 : vector<256xf32> to vector<1x256xf32>
    %cst_24 = arith.constant dense<0.000000e+00> : vector<256xf32>
    %63 = vector.multi_reduction <add>, %59, %cst_24 [0] : vector<4x256xf32> to vector<256xf32>
    %64 = vector.shape_cast %63 : vector<256xf32> to vector<1x256xf32>
    %65 = arith.divf %62, %64 : vector<1x256xf32>
    %66 = vector.shape_cast %65 : vector<1x256xf32> to vector<1x256xf32>
    %67 = vector.broadcast %66 : vector<1x256xf32> to vector<4x256xf32>
    %68 = tpu.concatenate %52, %67 in 0 : vector<4x256xf32>, vector<4x256xf32> -> vector<8x256xf32>
    %69 = arith.mulf %8, %68 : vector<8x256xf32>
    %70 = arith.addf %69, %34 : vector<8x256xf32>
    %71 = arith.addf %70, %9 : vector<8x256xf32>
    %cst_25 = arith.constant dense<0.000000e+00> : vector<8x256xf32>
    %72 = tpu.matmul %4, %71, %cst_25 {dimension_numbers = #tpu.dot_dimension_numbers<[1], [0], [0], [1], [0, 0, 1, 1], [], []>} : vector<8x8xf32>, vector<8x256xf32>, vector<8x256xf32> -> vector<8x256xf32>
    %73 = vector.broadcast %5 : vector<8x1xf32> to vector<8x256xf32>
    %74 = arith.addf %72, %73 : vector<8x256xf32>
    %c0_26 = arith.constant 0 : index
    %c0_27 = arith.constant 0 : index
    %c0_28 = arith.constant 0 : index
    %75 = vector.load %arg8[%c0_26, %c0_27, %c0_28] : memref<2x8x256xf32, #tpu.memory_space<vmem>>, vector<1x8x256xf32>
    %76 = vector.shape_cast %75 : vector<1x8x256xf32> to vector<8x256xf32>
    %77 = vector.shape_cast %74 : vector<8x256xf32> to vector<1x8x256xf32>
    tpu.vector_store %arg8[%c0_26, %c0_27, %c0_28], %77 {strides = array<i32>} : memref<2x8x256xf32, #tpu.memory_space<vmem>>, vector<1x8x256xf32>,
    %c1 = arith.constant 1 : index
    %c0_29 = arith.constant 0 : index
    %c0_30 = arith.constant 0 : index
    %78 = vector.load %arg1[%c1, %c0_29, %c0_30] : memref<2x16x256xf32, #tpu.memory_space<vmem>>, vector<1x16x256xf32>
    %79 = vector.shape_cast %78 : vector<1x16x256xf32> to vector<16x256xf32>
    %80 = vector.extract_strided_slice %79 {offsets = [0, 0], sizes = [8, 256], strides = [1, 1]} : vector<16x256xf32> to vector<8x256xf32>
    %81 = vector.extract_strided_slice %79 {offsets = [8, 0], sizes = [8, 256], strides = [1, 1]} : vector<16x256xf32> to vector<8x256xf32>
    %cst_31 = arith.constant dense<0.000000e+00> : vector<8x256xf32>
    %82 = tpu.matmul %0, %80, %cst_31 {dimension_numbers = #tpu.dot_dimension_numbers<[1], [0], [0], [1], [0, 0, 1, 1], [], []>} : vector<8x8xf32>, vector<8x256xf32>, vector<8x256xf32> -> vector<8x256xf32>
    %83 = vector.broadcast %1 : vector<8x1xf32> to vector<8x256xf32>
    %84 = arith.addf %82, %83 : vector<8x256xf32>
    %85 = math.exp %84 : vector<8x256xf32>
    %cst_32 = arith.constant dense<0xFF800000> : vector<8xf32>
    %86 = vector.multi_reduction <maximumf>, %85, %cst_32 [1] : vector<8x256xf32> to vector<8xf32>
    %87 = vector.shape_cast %86 : vector<8xf32> to vector<8x1xf32>
    %88 = vector.broadcast %87 : vector<8x1xf32> to vector<8x256xf32>
    %89 = arith.subf %85, %88 : vector<8x256xf32>
    %90 = math.exp %89 : vector<8x256xf32>
    %91 = arith.mulf %90, %84 : vector<8x256xf32>
    %cst_33 = arith.constant dense<0.000000e+00> : vector<8xf32>
    %92 = vector.multi_reduction <add>, %91, %cst_33 [1] : vector<8x256xf32> to vector<8xf32>
    %93 = vector.shape_cast %92 : vector<8xf32> to vector<8x1xf32>
    %cst_34 = arith.constant dense<0.000000e+00> : vector<8xf32>
    %94 = vector.multi_reduction <add>, %90, %cst_34 [1] : vector<8x256xf32> to vector<8xf32>
    %95 = vector.shape_cast %94 : vector<8xf32> to vector<8x1xf32>
    %96 = arith.divf %93, %95 : vector<8x1xf32>
    %cst_35 = arith.constant dense<0.000000e+00> : vector<8x1xf32>
    %97 = tpu.matmul %2, %96, %cst_35 {dimension_numbers = #tpu.dot_dimension_numbers<[1], [0], [0], [1], [0, 0, 1, 1], [], []>} : vector<8x8xf32>, vector<8x1xf32>, vector<8x1xf32> -> vector<8x1xf32>
    %98 = arith.addf %97, %3 : vector<8x1xf32>
    %99 = arith.negf %98 : vector<8x1xf32>
    %100 = math.exp %99 : vector<8x1xf32>
    %cst_36 = arith.constant 1.000000e+00 : f32
    %101 = vector.broadcast %cst_36 : f32 to vector<8x1xf32>
    %102 = arith.addf %101, %100 : vector<8x1xf32>
    %103 = arith.divf %101, %102 : vector<8x1xf32>
    %104 = vector.extract_strided_slice %80 {offsets = [4, 0], sizes = [4, 256], strides = [1, 1]} : vector<8x256xf32> to vector<4x256xf32>
    %105 = vector.extract_strided_slice %80 {offsets = [0, 0], sizes = [4, 256], strides = [1, 1]} : vector<8x256xf32> to vector<4x256xf32>
    %106 = tpu.concatenate %104, %105 in 0 : vector<4x256xf32>, vector<4x256xf32> -> vector<8x256xf32>
    %107 = vector.broadcast %103 : vector<8x1xf32> to vector<8x256xf32>
    %108 = arith.mulf %80, %107 : vector<8x256xf32>
    %109 = arith.addf %108, %106 : vector<8x256xf32>
    %110 = vector.extract_strided_slice %109 {offsets = [0, 0], sizes = [4, 256], strides = [1, 1]} : vector<8x256xf32> to vector<4x256xf32>
    %111 = math.exp %110 : vector<4x256xf32>
    %cst_37 = arith.constant dense<0xFF800000> : vector<256xf32>
    %112 = vector.multi_reduction <maximumf>, %111, %cst_37 [0] : vector<4x256xf32> to vector<256xf32>
    %113 = vector.shape_cast %112 : vector<256xf32> to vector<1x256xf32>
    %114 = vector.broadcast %113 : vector<1x256xf32> to vector<4x256xf32>
    %115 = arith.subf %111, %114 : vector<4x256xf32>
    %116 = math.exp %115 : vector<4x256xf32>
    %117 = arith.mulf %116, %110 : vector<4x256xf32>
    %cst_38 = arith.constant dense<0.000000e+00> : vector<256xf32>
    %118 = vector.multi_reduction <add>, %117, %cst_38 [0] : vector<4x256xf32> to vector<256xf32>
    %119 = vector.shape_cast %118 : vector<256xf32> to vector<1x256xf32>
    %cst_39 = arith.constant dense<0.000000e+00> : vector<256xf32>
    %120 = vector.multi_reduction <add>, %116, %cst_39 [0] : vector<4x256xf32> to vector<256xf32>
    %121 = vector.shape_cast %120 : vector<256xf32> to vector<1x256xf32>
    %122 = arith.divf %119, %121 : vector<1x256xf32>
    %123 = vector.shape_cast %122 : vector<1x256xf32> to vector<1x256xf32>
    %124 = vector.broadcast %123 : vector<1x256xf32> to vector<4x256xf32>
    %125 = vector.extract_strided_slice %109 {offsets = [4, 0], sizes = [4, 256], strides = [1, 1]} : vector<8x256xf32> to vector<4x256xf32>
    %126 = math.exp %125 : vector<4x256xf32>
    %cst_40 = arith.constant dense<0xFF800000> : vector<256xf32>
    %127 = vector.multi_reduction <maximumf>, %126, %cst_40 [0] : vector<4x256xf32> to vector<256xf32>
    %128 = vector.shape_cast %127 : vector<256xf32> to vector<1x256xf32>
    %129 = vector.broadcast %128 : vector<1x256xf32> to vector<4x256xf32>
    %130 = arith.subf %126, %129 : vector<4x256xf32>
    %131 = math.exp %130 : vector<4x256xf32>
    %132 = arith.mulf %131, %125 : vector<4x256xf32>
    %cst_41 = arith.constant dense<0.000000e+00> : vector<256xf32>
    %133 = vector.multi_reduction <add>, %132, %cst_41 [0] : vector<4x256xf32> to vector<256xf32>
    %134 = vector.shape_cast %133 : vector<256xf32> to vector<1x256xf32>
    %cst_42 = arith.constant dense<0.000000e+00> : vector<256xf32>
    %135 = vector.multi_reduction <add>, %131, %cst_42 [0] : vector<4x256xf32> to vector<256xf32>
    %136 = vector.shape_cast %135 : vector<256xf32> to vector<1x256xf32>
    %137 = arith.divf %134, %136 : vector<1x256xf32>
    %138 = vector.shape_cast %137 : vector<1x256xf32> to vector<1x256xf32>
    %139 = vector.broadcast %138 : vector<1x256xf32> to vector<4x256xf32>
    %140 = tpu.concatenate %124, %139 in 0 : vector<4x256xf32>, vector<4x256xf32> -> vector<8x256xf32>
    %141 = arith.mulf %80, %140 : vector<8x256xf32>
    %142 = arith.addf %141, %106 : vector<8x256xf32>
    %143 = arith.addf %142, %81 : vector<8x256xf32>
    %cst_43 = arith.constant dense<0.000000e+00> : vector<8x256xf32>
    %144 = tpu.matmul %4, %143, %cst_43 {dimension_numbers = #tpu.dot_dimension_numbers<[1], [0], [0], [1], [0, 0, 1, 1], [], []>} : vector<8x8xf32>, vector<8x256xf32>, vector<8x256xf32> -> vector<8x256xf32>
    %145 = vector.broadcast %5 : vector<8x1xf32> to vector<8x256xf32>
    %146 = arith.addf %144, %145 : vector<8x256xf32>
    %c1_44 = arith.constant 1 : index
    %c0_45 = arith.constant 0 : index
    %c0_46 = arith.constant 0 : index
    %147 = vector.load %arg8[%c1_44, %c0_45, %c0_46] : memref<2x8x256xf32, #tpu.memory_space<vmem>>, vector<1x8x256xf32>
    %148 = vector.shape_cast %147 : vector<1x8x256xf32> to vector<8x256xf32>
    %149 = vector.shape_cast %146 : vector<8x256xf32> to vector<1x8x256xf32>
    tpu.vector_store %arg8[%c1_44, %c0_45, %c0_46], %149 {strides = array<i32>} : memref<2x8x256xf32, #tpu.memory_space<vmem>>, vector<1x8x256xf32>,
    return
  }
  func.func @transform_0(%arg0: i32) -> (i32, i32, i32) {
    %c0_i32 = arith.constant 0 : i32
    %c0_i32_0 = arith.constant 0 : i32
    %c0_i32_1 = arith.constant 0 : i32
    return %arg0, %c0_i32, %c0_i32_0 : i32, i32, i32
  }
  func.func @transform_1(%arg0: i32) -> (i32, i32) {
    %c0_i32 = arith.constant 0 : i32
    %c0_i32_0 = arith.constant 0 : i32
    %c0_i32_1 = arith.constant 0 : i32
    return %c0_i32, %c0_i32_0 : i32, i32
  }
  func.func @transform_2(%arg0: i32) -> (i32, i32) {
    %c0_i32 = arith.constant 0 : i32
    %c0_i32_0 = arith.constant 0 : i32
    %c0_i32_1 = arith.constant 0 : i32
    return %c0_i32, %c0_i32_0 : i32, i32
  }
  func.func @transform_3(%arg0: i32) -> (i32, i32) {
    %c0_i32 = arith.constant 0 : i32
    %c0_i32_0 = arith.constant 0 : i32
    %c0_i32_1 = arith.constant 0 : i32
    return %c0_i32, %c0_i32_0 : i32, i32
  }
  func.func @transform_4(%arg0: i32) -> (i32, i32) {
    %c0_i32 = arith.constant 0 : i32
    %c0_i32_0 = arith.constant 0 : i32
    %c0_i32_1 = arith.constant 0 : i32
    return %c0_i32, %c0_i32_0 : i32, i32
  }
  func.func @transform_5(%arg0: i32) -> (i32, i32) {
    %c0_i32 = arith.constant 0 : i32
    %c0_i32_0 = arith.constant 0 : i32
    %c0_i32_1 = arith.constant 0 : i32
    return %c0_i32, %c0_i32_0 : i32, i32
  }
  func.func @transform_6(%arg0: i32) -> (i32, i32) {
    %c0_i32 = arith.constant 0 : i32
    %c0_i32_0 = arith.constant 0 : i32
    %c0_i32_1 = arith.constant 0 : i32
    return %c0_i32, %c0_i32_0 : i32, i32
  }
  func.func @transform_7(%arg0: i32) -> (i32, i32, i32) {
    %c0_i32 = arith.constant 0 : i32
    %c0_i32_0 = arith.constant 0 : i32
    %c0_i32_1 = arith.constant 0 : i32
    return %arg0, %c0_i32, %c0_i32_0 : i32, i32, i32
  }
}

</mosaic_0001>

<bundles_post_ra>
// kernel: tpu_custom_call.1
= control target key start
LH: loop header
LB: loop body
LE: loop exit
PB: predicated region body
PF: predicated region fallthrough
CT: control target
= control target key end

     0   :  { %12 = vsyncpa [#allocation3], 0  ;;  %s1836_s0 = inlined_call_operand.hbm [shape: f32[4,16,256], index: 0, kind: input, shape index: {}]   ;;  %s1837_s1 = inlined_call_operand.vmem [shape: f32[8,8], index: 1, kind: input, shape index: {}]   ;;  %s1838_s2 = inlined_call_operand.vmem [shape: f32[8,1], index: 2, kind: input, shape index: {}]   ;;  %s1839_s3 = inlined_call_operand.vmem [shape: f32[8,8], index: 3, kind: input, shape index: {}]   ;;  %s1840_s4 = inlined_call_operand.vmem [shape: f32[8,1], index: 4, kind: input, shape index: {}]   ;;  %s1841_s5 = inlined_call_operand.vmem [shape: f32[8,8], index: 5, kind: input, shape index: {}]   ;;  %s1842_s6 = inlined_call_operand.vmem [shape: f32[8,1], index: 6, kind: input, shape index: {}]   ;;  %s1843_s7 = inlined_call_operand.hbm [shape: f32[4,8,256], index: 7, kind: output, shape index: {}]  }
   0x1   :  { %14 = vsyncpa [#allocation3 + $0x1], 0 }
   0x2   :  { %15 = vsyncpa [#allocation4], 0 }
   0x3   :  { %17 = vsyncpa [#allocation4 + $0x1], 0  ;;  %s1524_s24 = smov 0   ;;  %s1526_s25 = smov 0  }
   0x4   :  { %s1528_s26 = smov 0   ;;  %s1530_s27 = smov 0  }
   0x5 LB: > { %s1545_s28 = sadd.s32 4294967295, %s1473_s27   ;;  %s1210_s29 = sadd.s32 4294967294, %s1473_s27   ;;  %s1473_s27 = sphi %s1530_s27, %s1858_s27   ;;  %s1469_s26 = sphi %s1528_s26, %s1857_s26   ;;  %s1465_s25 = sphi %s1526_s25, %s1856_s25   ;;  %s1461_s24 = sphi %s1524_s24, %s1855_s24  }
   0x6   : > { %s1549_s30 = sadd.s32 1, %s1473_s27   ;;  %s30_s8 = sadd.s32 1, %s1469_s26 }
   0x7   : > { %s27_s9 = ssub.s32 %s1473_s27, %s1549_s30  ;;  %p37_p0 = scmp.ne.s32.totalorder %s1469_s26, %s1465_s25 }
   0x8   : > { %p28_p1 = scmp.eq.s32.totalorder %s27_s9, 0  ;;  %p38_p2 = scmp.eq.s32.totalorder %s1473_s27, 0 }
   0x9   : > { %p43_p3 = scmp.ne.s32.totalorder %s1465_s25, %s1461_s24  ;;  %p44_p4 = scmp.eq.s32.totalorder %s1545_s28, 0 }
   0xa   : > { %s1561_s10 = scalar_select %p28_p1, %s1469_s26, %s30_s8  }
   0xb   : > { %p1563_p5 = por %p38_p2, %p37_p0  ;;  %p1567_p6 = por %p44_p4, %p43_p3 }
   0xc   : > { %p193_p7 = scmp.eq.s32.totalorder %s1545_s28, 1  ;;  %p199_p8 = scmp.eq.s32.totalorder %s1210_s29, 1 }
   0xd   : > { %s1847_s12 = scalar_select %p1567_p6, 1, 0 }
   0xe   : > { %p1270_p10 = scmp.lt.s32.totalorder %s1473_s27, 2  ;;  %p1574_p11 = por %p193_p7, %p37_p0 }
   0xf   : > { %p1578_p12 = por %p199_p8, %p43_p3  ;;  %s237_s15 = sand.u32 1, %s1469_s26  }
  0x10   : > { %s1848_s13 = scalar_select %p1574_p11, 1, 0 }
  0x11   : > { %s1849_s14 = scalar_select %p1578_p12, 1, 0 }
  0x12   : > { %s1241_s16 = sshll.u32 %s1473_s27, 10  ;;  %s1213_s17 = sshll.u32 %s237_s15, 6 }
  0x13   : > { %s1587_s20 = scalar_lea.hbm %s1836_s0, %s1241_s16  ;;  %s241_s21 = scalar_lea.vmem [#allocation2], %s1213_s17 }
  0x14   : > { %s249_s22 = sshll.u32 %s241_s21, 4  ;;  %p1591_p13 = pnand %p1270_p10, %p1563_p5  ;;  %s1595_s22 = int_to_ptr.vmem [resolvable:$true] %s249_s22 }
  0x15   : > { %s1597_s29 = scalar_lea.sflag [#allocation3], %s237_s15  ;;  %s1381_s8 = scalar_lea.hbm %s1587_s20, 1024 }
  0x16   : > { %p1382_p0 = scmp.ne.s32.totalorder %s1587_s20, %s1381_s8  ;;  %p1383_p1 = pneg %p1591_p13 }
  0x17   : > { %s1386_s17 = scalar_lea.hbm %s1836_s0, 2048  ;;  %p1387_p4 = scmp.lt.s32.totalorder %s1587_s20, %s1836_s0 }
  0x18   : > { %p1384_p2 = pnand %p1383_p1, %p1382_p0  ;;  %p1388_p5 = scmp.lt.s32.totalorder %s1386_s17, %s1381_s8 }
  0x1a   : > { %p1385_p3 = pneg %p1384_p2  ;;  %p1389_p7 = por %p1388_p5, %p1387_p4 }
  0x1c   : > { %p1390_p8 = pnand %p1389_p7, %p1385_p3 }
  0x1e   : > { %1393 = shalt.err (!%p1390_p8)
}
  0x1f   : > { %s1394_s15 = scalar_lea.vmem %s1595_s22, 1024  ;;  %s1475_s19 = smov [#allocation2]  }
  0x20   : > { %p1395_p10 = scmp.ne.s32.totalorder %s1595_s22, %s1394_s15  ;;  %s1399_s21 = sshll.u32 %s1475_s19, 4  ;;  %s1400_s21 = int_to_ptr.vmem [resolvable:$false] %s1399_s21 }
  0x21   : > { %s1401_s9 = scalar_lea.vmem %s1400_s21, 2048  ;;  %p1402_p2 = scmp.lt.s32.totalorder %s1595_s22, %s1400_s21 }
  0x22   : > { %p1397_p9 = pnand %p1395_p10, %p1383_p1  ;;  %p1403_p12 = scmp.lt.s32.totalorder %s1401_s9, %s1394_s15 }
  0x24   : > { %p1398_p0 = pneg %p1397_p9  ;;  %p1404_p11 = por %p1403_p12, %p1402_p2 }
  0x26   : > { %p1405_p6 = pnand %p1404_p11, %p1398_p0 }
  0x28   : > { %1408 = shalt.err (!%p1405_p6)
}
  0x29   : > { %s1476_s8 = smov 256   ;;  %s1477_s16 = smov 16  }
  0x2a   : > { %1265 = dma.hbm_to_vmem [thread:$0]  (!%p1591_p13), %s1587_s20, 1024, %s1595_s22, %s1597_s29, %s1476_s8, %s1476_s8, %s1477_s16  }
  0x2b   : > { %p1217_p9 = scmp.ge.s32.totalorder %s1473_s27, 1  ;;  %p257_p1 = scmp.lt.s32.totalorder %s1473_s27, 3 }
  0x2d   : > { %p258_p3 = pnand %p1217_p9, %p257_p1 }
  0x2e   : > { %s1621_s17 = sand.u32 (!%p258_p3), 1, %s1465_s25   ;;  %p1851_p6 = scmp.ne.s32.totalorder (!%p258_p3), %s1847_s12, 0 }
  0x2f   : > { %261 = sbr.rel (%p258_p3) target bundleno = 1777 (0x6f1), region = 48  ;;  %s1218_s11 = sshll.u32 (!%p258_p3), %s1621_s17, 6 }
  0x30   : > { %s264_s18 = scalar_lea.sflag (!%p258_p3), [#allocation3], %s1621_s17  ;;  %s1625_s15 = scalar_lea.vmem (!%p258_p3), [#allocation2], %s1218_s11 }
  0x34   : > { %1452 = dma.done.wait (%p1851_p6), %s264_s18, 1024  }
  0x35   : > { %1454 = vsyncadd (%p1851_p6), %s264_s18, 4294966272  ;;  %v1478_v0 = vmov 0.0   ;;  %v1479_v1 = vmov 0   ;;  %v1634_v2 = vld [vmem:[%s1625_s15 + $0x8] sm:$0xff]  ;;  %v1637_v3 = vld [vmem:[%s1625_s15] sm:$0xff]  ;;  %vm315_vm0 = vcmask 64512  }
  0x36   : > { %383 = vmatprep.mubr.f32.mxu0 %v1478_v0  ;;  %1311 = vset.pattern.permute.xlu0 %v1479_v1  ;;  %v300_v4 = vld [vmem:[%s1837_s1] sm:$0xff]  ;;  %vm1480_vm1 = vmmov 0   ;;  %v1657_v32 = vld [vmem:[%s1625_s15 + $0x28] sm:$0xff]  ;;  %v494_v56 = vrot.slane %v1637_v3, 4  ;;  %v495_v57 = vrot.slane %v1634_v2, 4  ;;  %vm498_vm2 = vcmask 1043456  }
  0x37   : > { %1248 = vmatprep.subr.mxu1 %v1478_v0  ;;  %1312 = vset.pattern.permute.xlu1 %v1479_v1  ;;  %v301_v5 = vld [vmem:[%s1838_s2] sm:$0xff]  ;;  %vm568_vm3 = vcmask 1047556   ;;  %s1219_s20 = sshll.u32 %s1621_s17, 5  ;;  %s1243_s23 = sshll.u32 %s1545_s28, 9 }
  0x38   : > { %349 = vmatprep.subr.mxu0 %v1634_v2  ;;  %312 = vperm.xlu0 %1311, %v301_v5   ;;  %v1654_v31 = vld [vmem:[%s1839_s3] sm:$0xff]  ;;  %s1750_s22 = scalar_lea.vmem [#allocation5], %s1219_s20  ;;  %s1790_s19 = scalar_lea.hbm %s1843_s7, %s1243_s23 }
  0x39   : > { %350 = vmatpush1.msra.mxu0 %v1637_v3  ;;  %1250 = vmatprep.mubr.msk.f32.mxu1 %vm1480_vm1, %v1478_v0  ;;  %v1660_v33 = vld [vmem:[%s1625_s15 + $0x20] sm:$0xff]  ;;  %s1137_s12 = sshll.u32 %s1750_s22, 4  ;;  %s1123_s21 = scalar_lea.sflag [#allocation4], %s1621_s17  ;;  %s1784_s12 = int_to_ptr.vmem [resolvable:$true] %s1137_s12 }
  0x3a   : > { %1220 = vmatmul.mubr.msk.f32.vlgmr.msra.gmra.mxu0 %vm315_vm0, %v300_v4  ;;  %v1672_v34 = vld [vmem:[%s1840_s4] sm:$0xff]  ;;  %s1409_s28 = scalar_lea.vmem %s1784_s12, 512  ;;  %p1852_p12 = scmp.ne.s32.totalorder %s1848_s13, 0 }
  0x3b   : > { %715 = vmatprep.mubr.f32.mxu0 %v1478_v0  ;;  %p1410_p11 = scmp.ne.s32.totalorder %s1784_s12, %s1409_s28  ;;  %s1481_s9 = smov [#allocation5]  }
  0x3c   : > { %s1413_s8 = sshll.u32 %s1481_s9, 4  ;;  %s1414_s8 = int_to_ptr.vmem [resolvable:$false] %s1413_s8 }
  0x3d   : > { %p1411_p13 = pnand %p1410_p11, %p1852_p12  ;;  %s1415_s16 = scalar_lea.vmem %s1414_s8, 1024 }
  0x3e   : > { %p1416_p5 = scmp.lt.s32.totalorder %s1784_s12, %s1414_s8  ;;  %p1417_p7 = scmp.lt.s32.totalorder %s1415_s16, %s1409_s28 }
  0x3f   : > { %p1412_p4 = pneg %p1411_p13 }
  0x40   : > { %p1418_p8 = por %p1417_p7, %p1416_p5 }
  0x42   : > { %p1419_p10 = pnand %p1418_p8, %p1412_p4 }
  0xb3   : > { %v313_v6 = vpop.permute.xlu0 %312 }
  0xfa   : > { %v385_v7 = vpop.f32.mrf.mxu0 }
  0xfb   : > { %v386_v8 = vadd.f32 %v385_v7, %v313_v6 }
  0xfc   : > { %v387_v9 = vpop.f32.mrf.mxu0 }
  0xfd   : > { %v390_v10 = vmul.f32 1.442695, %v386_v8  ;;  %v388_v11 = vadd.f32 %v387_v9, %v313_v6 }
  0xff   : > { %v392_v12 = vmul.f32 1.442695, %v388_v11  ;;  %1313 = vpow2.f32 %v390_v10 }
 0x101   : > { %1315 = vpow2.f32 %v392_v12 }
 0x10c   : > { %v1314_v13 = vpop.eup %1313 }
 0x10e   : > { %v1316_v14 = vpop.eup %1315 }
 0x10f   : > { %v394_v15 = vmax.f32 %v1314_v13, %v1316_v14 }
 0x111   : > { %395 = vmax.xlane.f32.xlu0 %v394_v15 }
 0x19a   : > { %v396_v16 = vpop.xlane.xlu0 %395 }
 0x19b   : > { %v397_v17 = vsub.f32 %v1314_v13, %v396_v16  ;;  %v398_v18 = vsub.f32 %v1316_v14, %v396_v16 }
 0x19d   : > { %v399_v19 = vmul.f32 1.442695, %v397_v17  ;;  %v401_v20 = vmul.f32 1.442695, %v398_v18 }
 0x19f   : > { %1317 = vpow2.f32 %v399_v19 }
 0x1a0   : > { %1319 = vpow2.f32 %v401_v20 }
 0x1ac   : > { %v1318_v21 = vpop.eup %1317 }
 0x1ad   : > { %v1320_v22 = vpop.eup %1319  ;;  %v403_v24 = vmul.f32 %v1318_v21, %v386_v8 }
 0x1ae   : > { %v408_v23 = vadd.f32 %v1320_v22, %v1318_v21  ;;  %v404_v25 = vmul.f32 %v1320_v22, %v388_v11 }
 0x1b0   : > { %409 = vadd.xlane.f32.xlu1 %v408_v23  ;;  %v405_v26 = vadd.f32 %v404_v25, %v403_v24 }
 0x1b4   : > { %406 = vadd.xlane.f32.xlu1 %v405_v26 }
 0x239   : > { %v410_v27 = vpop.xlane.xlu1 %409 }
 0x23a   : > { %1321 = vrcp.f32 %v410_v27 }
 0x23d   : > { %v407_v29 = vpop.xlane.xlu1 %406 }
 0x247   : > { %v1322_v28 = vpop.eup %1321 }
 0x248   : > { %v412_v30 = vmul.f32 %v1322_v28, %v407_v29 }
 0x24a   : > { %1249 = vmatpush3.msra.mxu1 %v412_v30 }
 0x24b   : > { %1251 = vmatmul.mubr.msk.f32.vlgmr.msra.gmra.mxu1 %vm315_vm0, %v1654_v31  ;;  %759 = vmatprep.subr.mxu1 %v1657_v32 }
 0x24c   : > { %760 = vmatpush1.msra.mxu1 %v1660_v33  ;;  %793 = vmatprep.mubr.f32.mxu1 %v1478_v0 }
 0x24f   : > { %1228 = vmatmul.mubr.msk.f32.vlgmr.msra.gmra.mxu1 %vm315_vm0, %v300_v4 }
 0x250   : > { %1112 = vmatprep.mubr.f32.mxu1 %v1478_v0 }
 0x30b   : > { %v482_v35 = vpop.f32.mrf.mxu1 }
 0x30c   : > { %v483_v36 = vadd.f32 %v482_v35, %v1672_v34 }
 0x30d   : > { %v1252_v37 = vpop.f32.mrf.mxu1 }
 0x30e   : > { %v1222_v39 = vmul.f32 -1.442695, %v483_v36 }
 0x30f   : > { %v795_v38 = vpop.f32.mrf.mxu1 }
 0x310   : > { %v796_v40 = vadd.f32 %v795_v38, %v313_v6  ;;  %1323 = vpow2.f32 %v1222_v39 }
 0x311   : > { %v797_v41 = vpop.f32.mrf.mxu1 }
 0x312   : > { %v800_v42 = vmul.f32 1.442695, %v796_v40  ;;  %v798_v43 = vadd.f32 %v797_v41, %v313_v6 }
 0x314   : > { %v802_v44 = vmul.f32 1.442695, %v798_v43  ;;  %1325 = vpow2.f32 %v800_v42 }
 0x316   : > { %1327 = vpow2.f32 %v802_v44 }
 0x31d   : > { %v1324_v45 = vpop.eup %1323 }
 0x31e   : > { %v489_v49 = vadd.f32 1.0, %v1324_v45 }
 0x320   : > { %1329 = vrcp.f32 %v489_v49 }
 0x321   : > { %v1326_v46 = vpop.eup %1325 }
 0x323   : > { %v1328_v47 = vpop.eup %1327 }
 0x324   : > { %v804_v48 = vmax.f32 %v1326_v46, %v1328_v47 }
 0x326   : > { %805 = vmax.xlane.f32.xlu1 %v804_v48 }
 0x32d   : > { %v1330_v50 = vpop.eup %1329 }
 0x337   : > { %503 = vperm.xlu1 %1312, %v1330_v50  }
 0x3af   : > { %v806_v51 = vpop.xlane.xlu1 %805 }
 0x3b0   : > { %v807_v52 = vsub.f32 %v1326_v46, %v806_v51  ;;  %v808_v53 = vsub.f32 %v1328_v47, %v806_v51 }
 0x3b2   : > { %v809_v54 = vmul.f32 1.442695, %v807_v52  ;;  %v811_v55 = vmul.f32 1.442695, %v808_v53 }
 0x3b3   : > { %v504_v58 = vpop.permute.xlu1 %503 }
 0x3b4   : > { %1331 = vpow2.f32 %v809_v54  ;;  %v506_v59 = vmul.f32 %v504_v58, %v1637_v3  ;;  %v507_v60 = vmul.f32 %v504_v58, %v1634_v2 }
 0x3b5   : > { %1333 = vpow2.f32 %v811_v55 }
 0x3b6   : > { %v1681_v61 = vadd.f32 %v506_v59, %v494_v56  ;;  %v1685_v62 = vadd.f32 %v507_v60, %v495_v57 }
 0x3b8   : > { %v510_v63 = vmul.f32 1.442695, %v1681_v61  ;;  %v512_v1 = vmul.f32 1.442695, %v1685_v62 }
 0x3ba   : > { %1335 = vpow2.f32 %v510_v63 }
 0x3bb   : > { %1337 = vpow2.f32 %v512_v1 }
 0x3c1   : > { %v1332_v4 = vpop.eup %1331 }
 0x3c2   : > { %v1334_v5 = vpop.eup %1333  ;;  %v813_v6 = vmul.f32 %v1332_v4, %v796_v40 }
 0x3c3   : > { %v818_v7 = vadd.f32 %v1334_v5, %v1332_v4  ;;  %v814_v8 = vmul.f32 %v1334_v5, %v798_v43 }
 0x3c5   : > { %819 = vadd.xlane.f32.xlu1 %v818_v7  ;;  %v815_v9 = vadd.f32 %v814_v8, %v813_v6 }
 0x3c7   : > { %v1336_v10 = vpop.eup %1335  ;;  %816 = vadd.xlane.f32.xlu0 %v815_v9 }
 0x3c8   : > { %v1338_v11 = vpop.eup %1337  ;;  %v514_v12 = vsel %vm498_vm2, %v1336_v10, -inf  ;;  %v569_v13 = vsel %vm568_vm3, %v1336_v10, -inf }
 0x3c9   : > { %v515_v14 = vrot.slane %v514_v12, 4  ;;  %v521_v15 = vsel %vm498_vm2, %v1338_v11, -inf  ;;  %v570_v16 = vrot.slane %v569_v13, 4  ;;  %v576_v17 = vsel %vm568_vm3, %v1338_v11, -inf }
 0x3ca   : > { %v522_v18 = vrot.slane %v521_v15, 4  ;;  %v577_v19 = vrot.slane %v576_v17, 4 }
 0x3cb   : > { %v516_v20 = vmax.f32 %v514_v12, %v515_v14  ;;  %v571_v21 = vmax.f32 %v569_v13, %v570_v16 }
 0x3cc   : > { %v523_v22 = vmax.f32 %v521_v15, %v522_v18  ;;  %v578_v23 = vmax.f32 %v576_v17, %v577_v19 }
 0x3cd   : > { %v517_v24 = vrot.slane %v516_v20, 2  ;;  %v572_v25 = vrot.slane %v571_v21, 2 }
 0x3ce   : > { %v524_v26 = vrot.slane %v523_v22, 2  ;;  %v579_v27 = vrot.slane %v578_v23, 2 }
 0x3cf   : > { %v518_v28 = vmax.f32 %v516_v20, %v517_v24  ;;  %v573_v29 = vmax.f32 %v571_v21, %v572_v25 }
 0x3d0   : > { %v525_v30 = vmax.f32 %v523_v22, %v524_v26  ;;  %v580_v35 = vmax.f32 %v578_v23, %v579_v27 }
 0x3d1   : > { %v519_v36 = vrot.slane %v518_v28, 1  ;;  %v574_v37 = vrot.slane %v573_v29, 1 }
 0x3d2   : > { %v526_v38 = vrot.slane %v525_v30, 1  ;;  %v581_v39 = vrot.slane %v580_v35, 1 }
 0x3d3   : > { %v520_v40 = vmax.f32 %v518_v28, %v519_v36  ;;  %v575_v41 = vmax.f32 %v573_v29, %v574_v37 }
 0x3d4   : > { %v527_v42 = vmax.f32 %v525_v30, %v526_v38  ;;  %v582_v43 = vmax.f32 %v580_v35, %v581_v39 }
 0x3d5   : > { %v528_v44 = vsub.f32 %v1336_v10, %v520_v40  ;;  %v583_v45 = vsub.f32 %v1336_v10, %v575_v41 }
 0x3d6   : > { %v529_v46 = vsub.f32 %v1338_v11, %v527_v42  ;;  %v584_v47 = vsub.f32 %v1338_v11, %v582_v43 }
 0x3d7   : > { %v530_v48 = vmul.f32 1.442695, %v528_v44  ;;  %v585_v49 = vmul.f32 1.442695, %v583_v45 }
 0x3d8   : > { %v532_v50 = vmul.f32 1.442695, %v529_v46  ;;  %v587_v51 = vmul.f32 1.442695, %v584_v47 }
 0x3d9   : > { %1339 = vpow2.f32 %v530_v48 }
 0x3da   : > { %1341 = vpow2.f32 %v532_v50 }
 0x3db   : > { %1343 = vpow2.f32 %v585_v49 }
 0x3dc   : > { %1345 = vpow2.f32 %v587_v51 }
 0x3e6   : > { %v1340_v52 = vpop.eup %1339 }
 0x3e7   : > { %v1342_v53 = vpop.eup %1341  ;;  %v550_v54 = vsel %vm498_vm2, %v1340_v52, 0.0  ;;  %v534_v5 = vmul.f32 %v1340_v52, %v1681_v61 }
 0x3e8   : > { %v1344_v55 = vpop.eup %1343  ;;  %v551_v58 = vrot.slane %v550_v54, 4  ;;  %v557_v59 = vsel %vm498_vm2, %v1342_v53, 0.0  ;;  %v535_v18 = vmul.f32 %v1342_v53, %v1685_v62 }
 0x3e9   : > { %v1346_v60 = vpop.eup %1345  ;;  %v589_v63 = vmul.f32 %v1344_v55, %v1681_v61  ;;  %v613_v1 = vrot.slane %v1344_v55, 4  ;;  %v558_v4 = vrot.slane %v557_v59, 4  ;;  %v536_v15 = vsel %vm498_vm2, %v534_v5, 0.0 }
 0x3ea   : > { %v552_v6 = vadd.f32 %v551_v58, %v550_v54  ;;  %v590_v7 = vmul.f32 %v1346_v60, %v1685_v62  ;;  %v614_v14 = vrot.slane %v1346_v60, 4  ;;  %v537_v23 = vrot.slane %v536_v15, 4 }
 0x3eb   : > { %v593_v8 = vrot.slane %v589_v63, 4  ;;  %v617_v9 = vsel %vm498_vm2, %v613_v1, 0.0  ;;  %v559_v10 = vadd.f32 %v558_v4, %v557_v59  ;;  %v543_v27 = vsel %vm498_vm2, %v535_v18, 0.0 }
 0x3ec   : > { %v553_v11 = vrot.slane %v552_v6, 2  ;;  %v618_v12 = vrot.slane %v617_v9, 4  ;;  %v594_v19 = vrot.slane %v590_v7, 4  ;;  %v624_v22 = vsel %vm498_vm2, %v614_v14, 0.0 }
 0x3ed   : > { %v560_v13 = vrot.slane %v559_v10, 2  ;;  %v597_v17 = vsel %vm498_vm2, %v593_v8, 0.0  ;;  %v625_v26 = vrot.slane %v624_v22, 4  ;;  %v538_v37 = vadd.f32 %v537_v23, %v536_v15 }
 0x3ee   : > { %v554_v16 = vadd.f32 %v553_v11, %v552_v6  ;;  %v619_v61 = vadd.f32 %v618_v12, %v617_v9  ;;  %v598_v24 = vrot.slane %v597_v17, 4  ;;  %v604_v29 = vsel %vm498_vm2, %v594_v19, 0.0 }
 0x3ef   : > { %v561_v21 = vadd.f32 %v560_v13, %v559_v10  ;;  %v626_v36 = vadd.f32 %v625_v26, %v624_v22  ;;  %v544_v39 = vrot.slane %v543_v27, 4  ;;  %v605_v40 = vrot.slane %v604_v29, 4 }
 0x3f0   : > { %v555_v20 = vrot.slane %v554_v16, 1  ;;  %v620_v25 = vrot.slane %v619_v61, 2  ;;  %v599_v62 = vadd.f32 %v598_v24, %v597_v17  ;;  %v539_v45 = vrot.slane %v538_v37, 2 }
 0x3f1   : > { %v562_v35 = vrot.slane %v561_v21, 1  ;;  %v627_v41 = vrot.slane %v626_v36, 2  ;;  %v545_v47 = vadd.f32 %v544_v39, %v543_v27  ;;  %v606_v48 = vadd.f32 %v605_v40, %v604_v29 }
 0x3f2   : > { %v556_v28 = vadd.f32 %v555_v20, %v554_v16  ;;  %v621_v30 = vadd.f32 %v620_v25, %v619_v61  ;;  %v600_v46 = vrot.slane %v599_v62, 2  ;;  %v540_v51 = vadd.f32 %v539_v45, %v538_v37  ;;  %v308_v20 = vld [vmem:[%s1625_s15 + $0x10] sm:$0xff]  ;;  %v1718_v25 = vld [vmem:[%s1841_s5] sm:$0xff] }
 0x3f3   : > { %v563_v43 = vadd.f32 %v562_v35, %v561_v21  ;;  %v628_v44 = vadd.f32 %v627_v41, %v626_v36  ;;  %v546_v53 = vrot.slane %v545_v47, 2  ;;  %v607_v54 = vrot.slane %v606_v48, 2  ;;  %v309_v21 = vld [vmem:[%s1625_s15 + $0x18] sm:$0xff] }
 0x3f4   : > { %v622_v38 = vrot.slane %v621_v30, 1  ;;  %1347 = vrcp.f32 %v556_v28  ;;  %v601_v52 = vadd.f32 %v600_v46, %v599_v62  ;;  %v541_v55 = vrot.slane %v540_v51, 1  ;;  %v305_v62 = vld [vmem:[%s1842_s6] sm:$0xff] }
 0x3f5   : > { %v629_v49 = vrot.slane %v628_v44, 1  ;;  %v547_v59 = vadd.f32 %v546_v53, %v545_v47  ;;  %v608_v60 = vadd.f32 %v607_v54, %v606_v48 }
 0x3f6   : > { %v623_v42 = vadd.f32 %v622_v38, %v621_v30  ;;  %v602_v58 = vrot.slane %v601_v52, 1  ;;  %v542_v1 = vadd.f32 %v541_v55, %v540_v51  ;;  %v902_v38 = vrot.slane %v1657_v32, 4 }
 0x3f7   : > { %v630_v50 = vadd.f32 %v629_v49, %v628_v44  ;;  %v548_v6 = vrot.slane %v547_v59, 1  ;;  %v609_v7 = vrot.slane %v608_v60, 1 }
 0x3f8   : > { %1349 = vrcp.f32 %v623_v42  ;;  %v603_v4 = vadd.f32 %v602_v58, %v601_v52 }
 0x3f9   : > { %1351 = vrcp.f32 %v563_v43  ;;  %v549_v12 = vadd.f32 %v548_v6, %v547_v59  ;;  %v610_v14 = vadd.f32 %v609_v7, %v608_v60 }
 0x3fa   : > { %1353 = vrcp.f32 %v630_v50 }
 0x401   : > { %v1348_v63 = vpop.eup %1347 }
 0x402   : > { %v565_v8 = vmul.f32 %v1348_v63, %v542_v1 }
 0x405   : > { %v1350_v5 = vpop.eup %1349 }
 0x406   : > { %v632_v9 = vmul.f32 %v1350_v5, %v603_v4  ;;  %v1352_v10 = vpop.eup %1351 }
 0x407   : > { %v1354_v15 = vpop.eup %1353  ;;  %v567_v16 = vmul.f32 %v1352_v10, %v549_v12 }
 0x408   : > { %v635_v11 = vsel %vm498_vm2, %v565_v8, %v632_v9  ;;  %v634_v17 = vmul.f32 %v1354_v15, %v610_v14 }
 0x409   : > { %v637_v13 = vmul.f32 %v635_v11, %v1637_v3 }
 0x40a   : > { %v636_v19 = vsel %vm498_vm2, %v567_v16, %v634_v17 }
 0x40b   : > { %v639_v18 = vadd.f32 %v637_v13, %v494_v56  ;;  %v638_v61 = vmul.f32 %v636_v19, %v1634_v2 }
 0x40d   : > { %v640_v22 = vadd.f32 %v638_v61, %v495_v57  ;;  %v641_v23 = vadd.f32 %v639_v18, %v308_v20 }
 0x40f   : > { %v642_v24 = vadd.f32 %v640_v22, %v309_v21 }
 0x411   : > { %681 = vmatprep.subr.mxu0 %v642_v24 }
 0x412   : > { %682 = vmatpush1.msra.mxu0 %v641_v23 }
 0x413   : > { %1223 = vmatmul.mubr.msk.f32.vlgmr.msra.gmra.mxu0 %vm315_vm0, %v1718_v25  ;;  %1253 = vmatprep.subr.mxu0 %v1478_v0 }
 0x414   : > { %1255 = vmatprep.mubr.msk.f32.mxu0 %vm1480_vm1, %v1478_v0 }
 0x44e   : > { %v820_v3 = vpop.xlane.xlu1 %819 }
 0x44f   : > { %1355 = vrcp.f32 %v820_v3 }
 0x450   : > { %v817_v56 = vpop.xlane.xlu0 %816 }
 0x45c   : > { %v1356_v2 = vpop.eup %1355 }
 0x45d   : > { %v822_v57 = vmul.f32 %v1356_v2, %v817_v56 }
 0x45f   : > { %1254 = vmatpush3.msra.mxu0 %v822_v57 }
 0x460   : > { %1256 = vmatmul.mubr.msk.f32.vlgmr.msra.gmra.mxu0 %vm315_vm0, %v1654_v31  ;;  %v901_v31 = vrot.slane %v1660_v33, 4 }
 0x4d3   : > { %v717_v26 = vpop.f32.mrf.mxu0 }
 0x4d5   : > { %v719_v27 = vpop.f32.mrf.mxu0 }
 0x520   : > { %v889_v28 = vpop.f32.mrf.mxu0 }
 0x521   : > { %v890_v29 = vadd.f32 %v889_v28, %v1672_v34 }
 0x522   : > { %v1257_v30 = vpop.f32.mrf.mxu0 }
 0x523   : > { %v1230_v35 = vmul.f32 -1.442695, %v890_v29 }
 0x525   : > { %1357 = vpow2.f32 %v1230_v35 }
 0x532   : > { %v1358_v36 = vpop.eup %1357 }
 0x533   : > { %v896_v0 = vadd.f32 1.0, %v1358_v36 }
 0x535   : > { %1359 = vrcp.f32 %v896_v0 }
 0x542   : > { %v1360_v37 = vpop.eup %1359 }
 0x543   : > { %909 = vperm.xlu0 %1311, %v1360_v37  }
 0x547   : > { %645 = vperm.xlu0 %1311, %v305_v62  }
 0x5be   : > { %v910_v39 = vpop.permute.xlu0 %909 }
 0x5bf   : > { %v912_v34 = vmul.f32 %v1660_v33, %v910_v39  ;;  %v913_v40 = vmul.f32 %v1657_v32, %v910_v39 }
 0x5c1   : > { %v1738_v41 = vadd.f32 %v912_v34, %v901_v31  ;;  %v1742_v42 = vadd.f32 %v913_v40, %v902_v38 }
 0x5c2   : > { %v1744_v43 = vpop.permute.xlu0 %645 }
 0x5c3   : > { %v916_v44 = vmul.f32 1.442695, %v1738_v41  ;;  %v918_v45 = vmul.f32 1.442695, %v1742_v42  ;;  %v718_v46 = vadd.f32 %v717_v26, %v1744_v43  ;;  %v720_v47 = vadd.f32 %v719_v27, %v1744_v43 }
 0x5c5   : > { %1361 = vpow2.f32 %v916_v44  ;;  %722 = vst [vmem:[%s1750_s22] sm:$0xff] %v718_v46  ;;  %723 = vst [vmem:[%s1750_s22 + $0x8] sm:$0xff] %v720_v47 }
 0x5c6   : > { %1363 = vpow2.f32 %v918_v45 }
 0x5d2   : > { %v1362_v48 = vpop.eup %1361 }
 0x5d3   : > { %v1364_v49 = vpop.eup %1363  ;;  %v920_v50 = vsel %vm498_vm2, %v1362_v48, -inf  ;;  %v974_v51 = vsel %vm568_vm3, %v1362_v48, -inf }
 0x5d4   : > { %v921_v52 = vrot.slane %v920_v50, 4  ;;  %v927_v53 = vsel %vm498_vm2, %v1364_v49, -inf  ;;  %v975_v54 = vrot.slane %v974_v51, 4  ;;  %v981_v55 = vsel %vm568_vm3, %v1364_v49, -inf }
 0x5d5   : > { %v928_v58 = vrot.slane %v927_v53, 4  ;;  %v982_v59 = vrot.slane %v981_v55, 4 }
 0x5d6   : > { %v922_v60 = vmax.f32 %v920_v50, %v921_v52  ;;  %v976_v63 = vmax.f32 %v974_v51, %v975_v54 }
 0x5d7   : > { %v929_v1 = vmax.f32 %v927_v53, %v928_v58  ;;  %v983_v4 = vmax.f32 %v981_v55, %v982_v59 }
 0x5d8   : > { %v923_v5 = vrot.slane %v922_v60, 2  ;;  %v977_v6 = vrot.slane %v976_v63, 2 }
 0x5d9   : > { %v930_v7 = vrot.slane %v929_v1, 2  ;;  %v984_v8 = vrot.slane %v983_v4, 2 }
 0x5da   : > { %v924_v9 = vmax.f32 %v922_v60, %v923_v5  ;;  %v978_v10 = vmax.f32 %v976_v63, %v977_v6 }
 0x5db   : > { %v931_v11 = vmax.f32 %v929_v1, %v930_v7  ;;  %v985_v12 = vmax.f32 %v983_v4, %v984_v8 }
 0x5dc   : > { %v925_v13 = vrot.slane %v924_v9, 1  ;;  %v979_v14 = vrot.slane %v978_v10, 1 }
 0x5dd   : > { %v932_v15 = vrot.slane %v931_v11, 1  ;;  %v986_v16 = vrot.slane %v985_v12, 1 }
 0x5de   : > { %v926_v17 = vmax.f32 %v924_v9, %v925_v13  ;;  %v980_v18 = vmax.f32 %v978_v10, %v979_v14 }
 0x5df   : > { %v933_v19 = vmax.f32 %v931_v11, %v932_v15  ;;  %v987_v61 = vmax.f32 %v985_v12, %v986_v16 }
 0x5e0   : > { %v934_v20 = vsub.f32 %v1362_v48, %v926_v17  ;;  %v988_v21 = vsub.f32 %v1362_v48, %v980_v18 }
 0x5e1   : > { %v935_v22 = vsub.f32 %v1364_v49, %v933_v19  ;;  %v989_v23 = vsub.f32 %v1364_v49, %v987_v61 }
 0x5e2   : > { %v936_v24 = vmul.f32 1.442695, %v934_v20  ;;  %v990_v3 = vmul.f32 1.442695, %v988_v21 }
 0x5e3   : > { %v938_v2 = vmul.f32 1.442695, %v935_v22  ;;  %v992_v56 = vmul.f32 1.442695, %v989_v23 }
 0x5e4   : > { %1365 = vpow2.f32 %v936_v24 }
 0x5e5   : > { %1367 = vpow2.f32 %v938_v2 }
 0x5e6   : > { %1369 = vpow2.f32 %v990_v3 }
 0x5e7   : > { %1371 = vpow2.f32 %v992_v56 }
 0x5f1   : > { %v1366_v57 = vpop.eup %1365 }
 0x5f2   : > { %v1368_v26 = vpop.eup %1367  ;;  %v956_v27 = vsel %vm498_vm2, %v1366_v57, 0.0  ;;  %v940_v62 = vmul.f32 %v1366_v57, %v1738_v41 }
 0x5f3   : > { %v1370_v28 = vpop.eup %1369  ;;  %v957_v29 = vrot.slane %v956_v27, 4  ;;  %v963_v30 = vsel %vm498_vm2, %v1368_v26, 0.0  ;;  %v941_v53 = vmul.f32 %v1368_v26, %v1742_v42 }
 0x5f4   : > { %v1372_v35 = vpop.eup %1371  ;;  %v994_v36 = vmul.f32 %v1370_v28, %v1738_v41  ;;  %v1018_v0 = vrot.slane %v1370_v28, 4  ;;  %v964_v37 = vrot.slane %v963_v30, 4  ;;  %v942_v50 = vsel %vm498_vm2, %v940_v62, 0.0 }
 0x5f5   : > { %v958_v39 = vadd.f32 %v957_v29, %v956_v27  ;;  %v995_v34 = vmul.f32 %v1372_v35, %v1742_v42  ;;  %v1019_v49 = vrot.slane %v1372_v35, 4  ;;  %v943_v60 = vrot.slane %v942_v50, 4 }
 0x5f6   : > { %v998_v40 = vrot.slane %v994_v36, 4  ;;  %v1022_v44 = vsel %vm498_vm2, %v1018_v0, 0.0  ;;  %v965_v45 = vadd.f32 %v964_v37, %v963_v30  ;;  %v949_v5 = vsel %vm498_vm2, %v941_v53, 0.0  ;;  %v1226_v53 = vld [vmem:[%s1625_s15 + $0x30] sm:$0xff] }
 0x5f7   : > { %v959_v46 = vrot.slane %v958_v39, 2  ;;  %v1023_v47 = vrot.slane %v1022_v44, 4  ;;  %v999_v54 = vrot.slane %v995_v34, 4  ;;  %v1029_v59 = vsel %vm498_vm2, %v1019_v49, 0.0 }
 0x5f8   : > { %v966_v48 = vrot.slane %v965_v45, 2  ;;  %v1002_v52 = vsel %vm498_vm2, %v998_v40, 0.0  ;;  %v1030_v4 = vrot.slane %v1029_v59, 4  ;;  %v944_v11 = vadd.f32 %v943_v60, %v942_v50 }
 0x5f9   : > { %v960_v51 = vadd.f32 %v959_v46, %v958_v39  ;;  %v1024_v41 = vadd.f32 %v1023_v47, %v1022_v44  ;;  %v1003_v63 = vrot.slane %v1002_v52, 4  ;;  %v1009_v7 = vsel %vm498_vm2, %v999_v54, 0.0  ;;  %v1227_v54 = vld [vmem:[%s1625_s15 + $0x38] sm:$0xff] }
 0x5fa   : > { %v967_v58 = vadd.f32 %v966_v48, %v965_v45  ;;  %v1031_v10 = vadd.f32 %v1030_v4, %v1029_v59  ;;  %v950_v13 = vrot.slane %v949_v5, 4  ;;  %v1010_v14 = vrot.slane %v1009_v7, 4 }
 0x5fb   : > { %v961_v55 = vrot.slane %v960_v51, 1  ;;  %v1025_v1 = vrot.slane %v1024_v41, 2  ;;  %v1004_v42 = vadd.f32 %v1003_v63, %v1002_v52  ;;  %v945_v19 = vrot.slane %v944_v11, 2 }
 0x5fc   : > { %v968_v9 = vrot.slane %v967_v58, 1  ;;  %v1032_v15 = vrot.slane %v1031_v10, 2  ;;  %v951_v20 = vadd.f32 %v950_v13, %v949_v5  ;;  %v1011_v21 = vadd.f32 %v1010_v14, %v1009_v7 }
 0x5fd   : > { %v962_v6 = vadd.f32 %v961_v55, %v960_v51  ;;  %v1026_v8 = vadd.f32 %v1025_v1, %v1024_v41  ;;  %v1005_v61 = vrot.slane %v1004_v42, 2  ;;  %v946_v24 = vadd.f32 %v945_v19, %v944_v11 }
 0x5fe   : > { %v969_v17 = vadd.f32 %v968_v9, %v967_v58  ;;  %v1033_v18 = vadd.f32 %v1032_v15, %v1031_v10  ;;  %v952_v2 = vrot.slane %v951_v20, 2  ;;  %v1012_v56 = vrot.slane %v1011_v21, 2 }
 0x5ff   : > { %v1027_v12 = vrot.slane %v1026_v8, 1  ;;  %1373 = vrcp.f32 %v962_v6  ;;  %v1006_v3 = vadd.f32 %v1005_v61, %v1004_v42  ;;  %v947_v57 = vrot.slane %v946_v24, 1 }
 0x600   : > { %v1034_v22 = vrot.slane %v1033_v18, 1  ;;  %v953_v27 = vadd.f32 %v952_v2, %v951_v20  ;;  %v1013_v28 = vadd.f32 %v1012_v56, %v1011_v21 }
 0x601   : > { %v1028_v16 = vadd.f32 %v1027_v12, %v1026_v8  ;;  %v1007_v26 = vrot.slane %v1006_v3, 1  ;;  %v948_v30 = vadd.f32 %v947_v57, %v946_v24 }
 0x602   : > { %v1035_v23 = vadd.f32 %v1034_v22, %v1033_v18  ;;  %v954_v0 = vrot.slane %v953_v27, 1  ;;  %v1014_v37 = vrot.slane %v1013_v28, 1 }
 0x603   : > { %1375 = vrcp.f32 %v1028_v16  ;;  %v1008_v35 = vadd.f32 %v1007_v26, %v1006_v3 }
 0x604   : > { %1377 = vrcp.f32 %v969_v17  ;;  %v955_v44 = vadd.f32 %v954_v0, %v953_v27  ;;  %v1015_v46 = vadd.f32 %v1014_v37, %v1013_v28 }
 0x605   : > { %1379 = vrcp.f32 %v1035_v23 }
 0x60c   : > { %v1374_v29 = vpop.eup %1373 }
 0x60d   : > { %v971_v62 = vmul.f32 %v1374_v29, %v948_v30 }
 0x610   : > { %v1376_v36 = vpop.eup %1375 }
 0x611   : > { %v1037_v39 = vmul.f32 %v1376_v36, %v1008_v35  ;;  %v1378_v34 = vpop.eup %1377 }
 0x612   : > { %v1380_v47 = vpop.eup %1379  ;;  %v973_v48 = vmul.f32 %v1378_v34, %v955_v44 }
 0x613   : > { %v1040_v40 = vsel %vm498_vm2, %v971_v62, %v1037_v39  ;;  %v1039_v49 = vmul.f32 %v1380_v47, %v1015_v46 }
 0x614   : > { %v1042_v45 = vmul.f32 %v1660_v33, %v1040_v40 }
 0x615   : > { %v1041_v51 = vsel %vm498_vm2, %v973_v48, %v1039_v49 }
 0x616   : > { %v1044_v50 = vadd.f32 %v1042_v45, %v901_v31  ;;  %v1043_v52 = vmul.f32 %v1657_v32, %v1041_v51 }
 0x618   : > { %v1045_v41 = vadd.f32 %v1043_v52, %v902_v38  ;;  %v1046_v55 = vadd.f32 %v1226_v53, %v1044_v50 }
 0x61a   : > { %v1047_v58 = vadd.f32 %v1227_v54, %v1045_v41 }
 0x61c   : > { %1078 = vmatprep.subr.mxu1 %v1047_v58 }
 0x61d   : > { %1079 = vmatpush1.msra.mxu1 %v1046_v55 }
 0x61e   : > { %1231 = vmatmul.mubr.msk.f32.vlgmr.msra.gmra.mxu1 %vm315_vm0, %v1718_v25 }
 0x6de   : > { %v1114_v33 = vpop.f32.mrf.mxu1 }
 0x6df   : > { %v1115_v32 = vadd.f32 %v1114_v33, %v1744_v43 }
 0x6e0   : > { %v1116_v31 = vpop.f32.mrf.mxu1 }
 0x6e1   : > { %1232 = vst [vmem:[%s1750_s22 + $0x10] sm:$0xff] %v1115_v32  ;;  %v1117_v38 = vadd.f32 %v1116_v31, %v1744_v43 }
 0x6e3   : > { %1233 = vst [vmem:[%s1750_s22 + $0x18] sm:$0xff] %v1117_v38 }
 0x6e4   : > { %1422 = shalt.err (!%p1419_p10)
}
 0x6e5   : > { %s1423_s11 = scalar_lea.hbm %s1790_s19, 512  ;;  %s1427_s22 = scalar_lea.hbm %s1843_s7, 1024 }
 0x6e6   : > { %p1424_p0 = scmp.ne.s32.totalorder %s1790_s19, %s1423_s11  ;;  %p1428_p1 = scmp.lt.s32.totalorder %s1790_s19, %s1843_s7 }
 0x6e7   : > { %p1429_p3 = scmp.lt.s32.totalorder %s1427_s22, %s1423_s11 }
 0x6e8   : > { %p1425_p2 = pnand %p1424_p0, %p1852_p12 }
 0x6e9   : > { %p1430_p6 = por %p1429_p3, %p1428_p1 }
 0x6ea   : > { %p1426_p9 = pneg %p1425_p2 }
 0x6ec   : > { %p1431_p11 = pnand %p1430_p6, %p1426_p9 }
 0x6ee   : > { %1434 = shalt.err (!%p1431_p11)
}
 0x6ef   : > { %s1482_s29 = smov 256   ;;  %s1483_s28 = smov 16  }
 0x6f0   : > { %1260 = dma.vmem_to_hbm [thread:$0]  (%p1852_p12), %s1784_s12, 512, %s1790_s19, %s1123_s21, %s1482_s29, %s1482_s29, %s1483_s28  }
 0x6f1 PF: > { %s1152_s9 = sand.u32 1, %s1461_s24   ;;  %p1853_p13 = scmp.ne.s32.totalorder %s1849_s14, 0 }
 0x6f2   : > { %p1854_p4 = scmp.ge.s32.totalorder %s1473_s27, 2  ;;  %s1153_s8 = scalar_lea.sflag [#allocation4], %s1152_s9 }
 0x6f4   : > { %p1267_p5 = pnand %p1854_p4, %p1853_p13 }
 0x6f6   : > { %p1268_p7 = pneg %p1267_p5 }
 0x6f8   : > { %1456 = dma.done.wait (%p1268_p7), %s1153_s8, 512  }
 0x6f9   : > { %1458 = vsyncadd (%p1268_p7), %s1153_s8, 4294966784  ;;  %p20_p8 = scmp.ge.s32.totalorder %s1549_s30, 4   ;;  %s1855_s24 = smov %s1465_s25 }
 0x6fa   : > { %s1856_s25 = smov %s1469_s26  ;;  %s1857_s26 = smov %s1561_s10 }
 0x6fb   : > { %s1858_s27 = smov %s1549_s30  ;;  %22 = sbr.rel (!%p20_p8) target bundleno = 5 (0x5), region = 95 }
 0x700   :  { %1158 = vsyncpa [#allocation3], 1 }
 0x701   :  { %1160 = vsyncpa [#allocation3 + $0x1], 1 }
 0x702   :  { %1161 = vsyncpa [#allocation4], 1 }
 0x703   :  { %1163 = vsyncpa [#allocation4 + $0x1], 1 }

</bundles_post_ra>
